<compile_context>
chip_gen: v5e
topology: v5e:2x2
jax: 0.10.0
libtpu: 0.0.40
codegen_flags: <defaults>
</compile_context>

<pallas_src>
import jax
import jax.numpy as jnp
from jax.experimental import pallas as pl
from jax.experimental.pallas import tpu as pltpu


def _round_up(x, m):
    return ((x + m - 1) // m) * m


# --------------------------------------------------------------------------- #
# Kernel
# --------------------------------------------------------------------------- #
def gate_kernel(x_ent_ref, x_lit_ref, wg_ref, bg_ref, w12_ref, gb_ref, out_ref):
    """One batch tile: out = x_ent + gate * (tanh(x @ Wg + bg) - x_ent)."""
    x_ent = x_ent_ref[...]                                       # (TB, E) f32

    # Single K=(E+L) MXU operand: lane-concat of bf16 activations.  x_lit
    # already arrives as bf16 from HBM; x_ent is cast only at the MXU input.
    x_bf = jnp.concatenate(
        [x_ent.astype(jnp.bfloat16), x_lit_ref[...]], axis=1)    # (TB, E+L) bf16

    # Fused K=(E+L) dots, f32 accumulation.
    g_pre = jnp.dot(x_bf, wg_ref[...],
                    preferred_element_type=jnp.float32) + bg_ref[...]
    gate_pre = jnp.dot(x_bf, w12_ref[...],
                       preferred_element_type=jnp.float32) + gb_ref[...]

    g_embedded = jnp.tanh(g_pre)
    gate = jax.nn.sigmoid(gate_pre)

    # (1-gate)*x_ent + gate*g_embedded == x_ent + gate*(g_embedded - x_ent)
    out_ref[...] = (x_ent + gate * (g_embedded - x_ent)).astype(out_ref.dtype)


# --------------------------------------------------------------------------- #
# Wrapper
# --------------------------------------------------------------------------- #
def gate_forward(x_ent, x_lit, kparams, *, block_b=512):
    """x_ent: (B, O) f32, x_lit: (B, L) f32 or bf16 -> (B, O) f32."""
    B, E = x_ent.shape
    B2, L = x_lit.shape
    assert B == B2
    O = kparams["wg_t"].shape[1]
    assert E == O, "g1 is Linear(output_size, output_size) applied to x_ent"
    assert kparams["wg_t"].shape[0] == E + L

    # x_lit is only ever an MXU operand -> stream it at bf16 (half the HBM
    # read).  No-op if the caller already keeps it in bf16.
    x_lit = x_lit.astype(jnp.bfloat16)

    # 128-aligned batch tile; partial edge block instead of a wrapper-side pad.
    TB = min(int(block_b), _round_up(B, 128))
    TB = max(128, _round_up(TB, 128))
    grid = (pl.cdiv(B, TB),)

    # VMEM budget: single-copy resident weights/biases + double-buffered
    # activation tiles + in-kernel temporaries, with headroom, clamped so it
    # also leaves room under v7x's 64 MiB per-core VMEM.
    weight_bytes = 2 * (E + L) * O * 2                       # wg_t + w12_t, bf16
    bias_bytes = 2 * 8 * O * 4                               # (1,O) pads to 8 rows
    act_bytes = 2 * TB * (E * 4 + L * 2 + O * 4)             # 2x-buffered tiles
    tmp_bytes = TB * ((E + L) * 2 + 2 * O * 4)               # concat + f32 pre-acts
    vmem_bytes = int(1.3 * (weight_bytes + bias_bytes + act_bytes + tmp_bytes))
    vmem_bytes = min(max(vmem_bytes, 32 * 1024 * 1024), 48 * 1024 * 1024)

    row = lambda f: pl.BlockSpec((TB, f), lambda i: (i, 0))        # pipelined tile
    resident = pl.BlockSpec(memory_space=pltpu.MemorySpace.VMEM)   # whole array,
                                                                   # single copy

    out = pl.pallas_call(
        gate_kernel,
        out_shape=jax.ShapeDtypeStruct((B, O), x_ent.dtype),
        grid=grid,
        in_specs=[
            row(E),      # x_ent tile (f32, needed by epilogue)
            row(L),      # x_lit tile (bf16, MXU-only operand)
            resident,    # wg_t      (E+L, O) bf16
            resident,    # bg        (1, O)   f32
            resident,    # w12_t     (E+L, O) bf16
            resident,    # gate_bias (1, O)   f32
        ],
        out_specs=row(O),
        compiler_params=pltpu.CompilerParams(
            dimension_semantics=("parallel",),   # batch axis -> megacore split
            vmem_limit_bytes=vmem_bytes,
        ),
    )(x_ent, x_lit, kparams["wg_t"], kparams["bg"],
      kparams["w12_t"], kparams["gate_bias"])
    return out


# --------------------------------------------------------------------------- #
# Parameters (PyTorch layout) and one-time kernel-layout preparation
# --------------------------------------------------------------------------- #
def init_params(key, input_size, output_size, dtype=jnp.float32):
    """Deterministic synthetic params in PyTorch nn.Linear layout (out, in)."""
    lit_size = input_size - output_size
    k1, k2, k3, k4 = jax.random.split(key, 4)
    s_g = 1.0 / jnp.sqrt(input_size)
    s_g1 = 1.0 / jnp.sqrt(output_size)
    s_g2 = 1.0 / jnp.sqrt(lit_size)
    return {
        "g_weight": jax.random.uniform(k1, (output_size, input_size), dtype, -s_g, s_g),
        "g_bias": jax.random.uniform(k2, (output_size,), dtype, -s_g, s_g),
        "g1_weight": jax.random.uniform(k3, (output_size, output_size), dtype, -s_g1, s_g1),
        "g2_weight": jax.random.uniform(k4, (output_size, lit_size), dtype, -s_g2, s_g2),
        "gate_bias": jnp.zeros((output_size,), dtype),
    }


def prepare_params(tp):
    """One-time conversion to kernel layout: bf16 weights pre-transposed to
    (in, out), g1/g2 K-fused into a single (E+L, O) matrix, f32 (1, O) biases.
    Call this once at setup time, NOT per forward call."""
    O = tp["g_weight"].shape[0]
    wg_t = jnp.asarray(tp["g_weight"].T, jnp.bfloat16)             # (E+L, O)
    w1_t = jnp.asarray(tp["g1_weight"].T, jnp.bfloat16)            # (E, O)
    w2_t = jnp.asarray(tp["g2_weight"].T, jnp.bfloat16)            # (L, O)
    return {
        "wg_t": wg_t,
        "w12_t": jnp.concatenate([w1_t, w2_t], axis=0),            # (E+L, O)
        "bg": jnp.asarray(tp["g_bias"], jnp.float32).reshape(1, O),
        "gate_bias": jnp.asarray(tp["gate_bias"], jnp.float32).reshape(1, O),
    }


# --------------------------------------------------------------------------- #
# References
# --------------------------------------------------------------------------- #
def gate_reference_matched(x_ent, x_lit, kp):
    """Pure-JAX reference matching the kernel numerics (bf16 dots, f32 accum)."""
    x_bf = jnp.concatenate([x_ent, x_lit], axis=1).astype(jnp.bfloat16)
    g_embedded = jnp.tanh(
        jnp.dot(x_bf, kp["wg_t"], preferred_element_type=jnp.float32) + kp["bg"])
    gate = jax.nn.sigmoid(
        jnp.dot(x_bf, kp["w12_t"], preferred_element_type=jnp.float32)
        + kp["gate_bias"])
    return x_ent + gate * (g_embedded - x_ent)


def gate_reference_f32(x_ent, x_lit, tp):
    """Full-f32 reference of the original PyTorch math (sanity check)."""
    x = jnp.concatenate([x_ent, x_lit], axis=1)
    g_embedded = jnp.tanh(x @ tp["g_weight"].T + tp["g_bias"])
    gate = jax.nn.sigmoid(x_ent @ tp["g1_weight"].T + x_lit @ tp["g2_weight"].T
                          + tp["gate_bias"])
    return (1.0 - gate) * x_ent + gate * g_embedded


# --------------------------------------------------------------------------- #
# Demo / correctness check
# --------------------------------------------------------------------------- #
if __name__ == "__main__":
    output_size = 128          # x_ent feature dim (== O == E)
    lit_size = 128             # x_lit feature dim
    input_size = output_size + lit_size

    key = jax.random.PRNGKey(0)
    kp_, ke, kl, ke2, kl2 = jax.random.split(key, 5)

    torch_params = init_params(kp_, input_size, output_size)
    kparams = prepare_params(torch_params)            # one-time cast/layout

    # Case 1: small batch -> single grid step with a partial (masked) block.
    B1 = 20
    x_ent = jax.random.normal(ke, (B1, output_size), jnp.float32)
    x_lit = jax.random.normal(kl, (B1, lit_size), jnp.float32)
    out1 = jax.block_until_ready(gate_forward(x_ent, x_lit, kparams))
    assert out1.shape == (B1, output_size)

    ref_m1 = gate_reference_matched(x_ent, x_lit, kparams)
    ref_f1 = gate_reference_f32(x_ent, x_lit, torch_params)
    assert jnp.allclose(out1, ref_m1, atol=1e-3, rtol=1e-3), \
        "mismatch vs bf16-matched reference (case 1)"
    assert jnp.allclose(out1, ref_f1, atol=5e-2, rtol=0.0), \
        "mismatch vs f32 reference (case 1)"

    # Case 2: multi-step grid (grid=(3,)) with a partial edge block.
    B2 = 300
    x_ent2 = jax.random.normal(ke2, (B2, output_size), jnp.float32)
    x_lit2 = jax.random.normal(kl2, (B2, lit_size), jnp.float32)
    out2 = jax.block_until_ready(gate_forward(x_ent2, x_lit2, kparams,
                                              block_b=128))
    assert out2.shape == (B2, output_size)
    ref_m2 = gate_reference_matched(x_ent2, x_lit2, kparams)
    assert jnp.allclose(out2, ref_m2, atol=1e-3, rtol=1e-3), \
        "mismatch vs bf16-matched reference (case 2)"

    print("KERNEL_OK")
</pallas_src>

<mosaic_0001>
module attributes {stable_mosaic.version = 11 : i64} {
  func.func @gate_kernel(%arg0: i32, %arg1: memref<128x128xf32, #tpu.memory_space<vmem>>, %arg2: memref<128x128xbf16, #tpu.memory_space<vmem>>, %arg3: memref<256x128xbf16, #tpu.memory_space<vmem>>, %arg4: memref<1x128xf32, #tpu.memory_space<vmem>>, %arg5: memref<256x128xbf16, #tpu.memory_space<vmem>>, %arg6: memref<1x128xf32, #tpu.memory_space<vmem>>, %arg7: memref<128x128xf32, #tpu.memory_space<vmem>>) attributes {dimension_semantics = [#tpu.dimension_semantics<parallel>], iteration_bounds = array<i64: 1>, scalar_prefetch = 0 : i64, scratch_operands = 0 : i64, tpu.core_type = #tpu.core_type<tc>, window_params = [{transform_indices = @transform_0, window_bounds = array<i64: 128, 128>}, {transform_indices = @transform_1, window_bounds = array<i64: 128, 128>}, {pipeline_mode = #tpu.pipeline_mode<synchronous>, transform_indices = @transform_2, window_bounds = array<i64: 256, 128>}, {pipeline_mode = #tpu.pipeline_mode<synchronous>, transform_indices = @transform_3, window_bounds = array<i64: 1, 128>}, {pipeline_mode = #tpu.pipeline_mode<synchronous>, transform_indices = @transform_4, window_bounds = array<i64: 256, 128>}, {pipeline_mode = #tpu.pipeline_mode<synchronous>, transform_indices = @transform_5, window_bounds = array<i64: 1, 128>}, {transform_indices = @transform_6, window_bounds = array<i64: 128, 128>}]} {
    %c0 = arith.constant 0 : index
    %c0_0 = arith.constant 0 : index
    %0 = vector.load %arg1[%c0, %c0_0] : memref<128x128xf32, #tpu.memory_space<vmem>>, vector<128x128xf32>
    %1 = arith.truncf %0 : vector<128x128xf32> to vector<128x128xbf16>
    %c0_1 = arith.constant 0 : index
    %c0_2 = arith.constant 0 : index
    %2 = vector.load %arg2[%c0_1, %c0_2] : memref<128x128xbf16, #tpu.memory_space<vmem>>, vector<128x128xbf16>
    %3 = tpu.concatenate %1, %2 in 1 : vector<128x128xbf16>, vector<128x128xbf16> -> vector<128x256xbf16>
    %c0_3 = arith.constant 0 : index
    %c0_4 = arith.constant 0 : index
    %4 = vector.load %arg3[%c0_3, %c0_4] : memref<256x128xbf16, #tpu.memory_space<vmem>>, vector<256x128xbf16>
    %cst = arith.constant dense<0.000000e+00> : vector<128x128xf32>
    %5 = tpu.matmul %3, %4, %cst {dimension_numbers = #tpu.dot_dimension_numbers<[1], [0], [0], [1], [0, 0, 1, 1], [], []>} : vector<128x256xbf16>, vector<256x128xbf16>, vector<128x128xf32> -> vector<128x128xf32>
    %c0_5 = arith.constant 0 : index
    %c0_6 = arith.constant 0 : index
    %6 = vector.load %arg4[%c0_5, %c0_6] : memref<1x128xf32, #tpu.memory_space<vmem>>, vector<1x128xf32>
    %7 = vector.broadcast %6 : vector<1x128xf32> to vector<128x128xf32>
    %8 = arith.addf %5, %7 : vector<128x128xf32>
    %c0_7 = arith.constant 0 : index
    %c0_8 = arith.constant 0 : index
    %9 = vector.load %arg5[%c0_7, %c0_8] : memref<256x128xbf16, #tpu.memory_space<vmem>>, vector<256x128xbf16>
    %cst_9 = arith.constant dense<0.000000e+00> : vector<128x128xf32>
    %10 = tpu.matmul %3, %9, %cst_9 {dimension_numbers = #tpu.dot_dimension_numbers<[1], [0], [0], [1], [0, 0, 1, 1], [], []>} : vector<128x256xbf16>, vector<256x128xbf16>, vector<128x128xf32> -> vector<128x128xf32>
    %c0_10 = arith.constant 0 : index
    %c0_11 = arith.constant 0 : index
    %11 = vector.load %arg6[%c0_10, %c0_11] : memref<1x128xf32, #tpu.memory_space<vmem>>, vector<1x128xf32>
    %12 = vector.broadcast %11 : vector<1x128xf32> to vector<128x128xf32>
    %13 = arith.addf %10, %12 : vector<128x128xf32>
    %14 = math.tanh %8 : vector<128x128xf32>
    %15 = arith.negf %13 : vector<128x128xf32>
    %16 = math.exp %15 : vector<128x128xf32>
    %cst_12 = arith.constant 1.000000e+00 : f32
    %17 = vector.broadcast %cst_12 : f32 to vector<128x128xf32>
    %18 = arith.addf %17, %16 : vector<128x128xf32>
    %19 = arith.divf %17, %18 : vector<128x128xf32>
    %20 = arith.subf %14, %0 : vector<128x128xf32>
    %21 = arith.mulf %19, %20 : vector<128x128xf32>
    %22 = arith.addf %0, %21 : vector<128x128xf32>
    %c0_13 = arith.constant 0 : index
    %c0_14 = arith.constant 0 : index
    %23 = vector.load %arg7[%c0_13, %c0_14] : memref<128x128xf32, #tpu.memory_space<vmem>>, vector<128x128xf32>
    tpu.vector_store %arg7[%c0_13, %c0_14], %22 {strides = array<i32>} : memref<128x128xf32, #tpu.memory_space<vmem>>, vector<128x128xf32>,
    return
  }
  func.func @transform_0(%arg0: i32) -> (i32, i32) {
    %c0_i32 = arith.constant 0 : i32
    %c0_i32_0 = arith.constant 0 : i32
    return %arg0, %c0_i32 : i32, i32
  }
  func.func @transform_1(%arg0: i32) -> (i32, i32) {
    %c0_i32 = arith.constant 0 : i32
    %c0_i32_0 = arith.constant 0 : i32
    return %arg0, %c0_i32 : i32, i32
  }
  func.func @transform_2(%arg0: i32) -> (i32, i32) {
    %c0_i32 = arith.constant 0 : i32
    %c0_i32_0 = arith.constant 0 : i32
    %c0_i32_1 = arith.constant 0 : i32
    return %c0_i32, %c0_i32_0 : i32, i32
  }
  func.func @transform_3(%arg0: i32) -> (i32, i32) {
    %c0_i32 = arith.constant 0 : i32
    %c0_i32_0 = arith.constant 0 : i32
    %c0_i32_1 = arith.constant 0 : i32
    return %c0_i32, %c0_i32_0 : i32, i32
  }
  func.func @transform_4(%arg0: i32) -> (i32, i32) {
    %c0_i32 = arith.constant 0 : i32
    %c0_i32_0 = arith.constant 0 : i32
    %c0_i32_1 = arith.constant 0 : i32
    return %c0_i32, %c0_i32_0 : i32, i32
  }
  func.func @transform_5(%arg0: i32) -> (i32, i32) {
    %c0_i32 = arith.constant 0 : i32
    %c0_i32_0 = arith.constant 0 : i32
    %c0_i32_1 = arith.constant 0 : i32
    return %c0_i32, %c0_i32_0 : i32, i32
  }
  func.func @transform_6(%arg0: i32) -> (i32, i32) {
    %c0_i32 = arith.constant 0 : i32
    %c0_i32_0 = arith.constant 0 : i32
    return %arg0, %c0_i32 : i32, i32
  }
}

</mosaic_0001>

<bundles_post_ra>
// kernel: tpu_custom_call.1
= control target key start
LH: loop header
LB: loop body
LE: loop exit
PB: predicated region body
PF: predicated region fallthrough
CT: control target
= control target key end

     0   :  { %11 = vsyncpa [#allocation3], 0  ;;  %s1846_s0 = inlined_call_operand.hbm [shape: f32[20,128], index: 0, kind: input, shape index: {}]   ;;  %s1847_s1 = inlined_call_operand.hbm [shape: bf16[20,128], index: 1, kind: input, shape index: {}]   ;;  %s1848_s2 = inlined_call_operand.hbm [shape: bf16[256,128], index: 2, kind: input, shape index: {}]   ;;  %s1849_s3 = inlined_call_operand.vmem [shape: f32[1,128], index: 3, kind: input, shape index: {}]   ;;  %s1850_s4 = inlined_call_operand.hbm [shape: bf16[256,128], index: 4, kind: input, shape index: {}]   ;;  %s1851_s5 = inlined_call_operand.vmem [shape: f32[1,128], index: 5, kind: input, shape index: {}]   ;;  %s1852_s6 = inlined_call_operand.hbm [shape: f32[20,128], index: 6, kind: output, shape index: {}]  }
   0x1   :  { %12 = vsyncpa [#allocation6], 0 }
   0x2   :  { %13 = vsyncpa [#allocation9], 0 }
   0x3   :  { %14 = vsyncpa [#allocation4], 0 }
   0x4   :  { %18 = vsyncadd [#allocation3], 1664  ;;  %s19_s23 = sshll.u32 %s1846_s0, 4  ;;  %s1550_s24 = smov [#allocation2]   ;;  %s20_s23 = int_to_ptr.hbm [resolvable:$true] %s19_s23 }
   0x5   :  { %s21_s25 = sshll.u32 %s1550_s24, 4  ;;  %s1551_s26 = smov 128   ;;  %s22_s25 = int_to_ptr.vmem [resolvable:$true] %s21_s25 }
   0x6   :  { %s1552_s27 = smov 8  }
   0x7   :  { %27 = dma.hbm_to_vmem [thread:$0]  %s20_s23, 384, %s22_s25, [#allocation3], %s1551_s26, %s1551_s26, %s1552_s27  }
   0x8   :  { %31 = vsyncadd [#allocation6], 832  ;;  %s32_s30 = sshll.u32 %s1847_s1, 4  ;;  %s1553_s7 = smov [#allocation5]   ;;  %s33_s30 = int_to_ptr.hbm [resolvable:$true] %s32_s30 }
   0x9   :  { %s34_s8 = sshll.u32 %s1553_s7, 4  ;;  %s45_s10 = sshll.u32 %s1848_s2, 4  ;;  %s35_s8 = int_to_ptr.vmem [resolvable:$true] %s34_s8  ;;  %s46_s10 = int_to_ptr.hbm [resolvable:$true] %s45_s10 }
   0xa   :  { %s1554_s11 = smov 64   ;;  %s1555_s12 = smov 4  }
   0xb   :  { %40 = dma.hbm_to_vmem [thread:$0]  %s33_s30, 192, %s35_s8, [#allocation6], %s1554_s11, %s1554_s11, %s1555_s12  }
   0xc   :  { %s1556_s13 = smov [#allocation7]   ;;  %s60_s17 = sshll.u32 %s1850_s4, 4  ;;  %s61_s17 = int_to_ptr.hbm [resolvable:$true] %s60_s17 }
   0xd   :  { %s47_s14 = sshll.u32 %s1556_s13, 4  ;;  %s1557_s1 = smov [#allocation8]   ;;  %s48_s14 = int_to_ptr.vmem [resolvable:$true] %s47_s14 }
   0xe   :  { %53 = dma.hbm_to_vmem [thread:$0]  %s46_s10, 2048, %s48_s14, [#allocation6], %s1554_s11, %s1554_s11, %s1555_s12  }
   0xf   :  { %s62_s18 = sshll.u32 %s1557_s1, 4  ;;  %s63_s18 = int_to_ptr.vmem [resolvable:$true] %s62_s18 }
  0x10   :  { %68 = dma.hbm_to_vmem [thread:$0]  %s61_s17, 2048, %s63_s18, [#allocation9], %s1554_s11, %s1554_s11, %s1555_s12  }
  0x11   :  { %1542 = dma.done.wait [#allocation3], 2048  }
  0x12   :  { %1543 = vsyncadd [#allocation3], 4294965248 }
  0x13   :  { %1544 = dma.done.wait [#allocation6], 3072  }
  0x14   :  { %1545 = vsyncadd [#allocation6], 4294964224 }
  0x15   :  { %1546 = dma.done.wait [#allocation9], 2048  }
  0x16   :  { %1547 = vsyncadd [#allocation9], 4294965248  ;;  %v1303_v0 = vld [vmem:[#allocation8 + $0x38] sm:$0xff]  ;;  %v1302_v2 = vld [vmem:[#allocation8 + $0x30] sm:$0xff] }
  0x17   :  { %v1311_v1 = vld [vmem:[#allocation8 + $0x78] sm:$0xff]  ;;  %593 = vmatpush.bf16.msra.mxu2 %v1303_v0  ;;  %v1310_v3 = vld [vmem:[#allocation8 + $0x70] sm:$0xff]  ;;  %v1301_v8 = vld [vmem:[#allocation8 + $0x28] sm:$0xff] }
  0x18   :  { %642 = vmatpush.bf16.msra.mxu3 %v1311_v1  ;;  %v1287_v4 = vld [vmem:[#allocation7 + $0x38] sm:$0xff]  ;;  %v1286_v6 = vld [vmem:[#allocation7 + $0x30] sm:$0xff]  ;;  %v1309_v9 = vld [vmem:[#allocation8 + $0x68] sm:$0xff] }
  0x19   :  { %v1295_v5 = vld [vmem:[#allocation7 + $0x78] sm:$0xff]  ;;  %363 = vmatpush.bf16.msra.mxu0 %v1287_v4  ;;  %v1294_v7 = vld [vmem:[#allocation7 + $0x70] sm:$0xff]  ;;  %v1285_v10 = vld [vmem:[#allocation7 + $0x28] sm:$0xff] }
  0x1a   :  { %412 = vmatpush.bf16.msra.mxu1 %v1295_v5  ;;  %v1293_v11 = vld [vmem:[#allocation7 + $0x68] sm:$0xff]  ;;  %v1300_v12 = vld [vmem:[#allocation8 + $0x20] sm:$0xff]  ;;  %v1299_v16 = vld [vmem:[#allocation8 + $0x18] sm:$0xff] }
  0x1b   :  { %594 = vmatpush.bf16.msra.mxu2 %v1302_v2  ;;  %v1308_v13 = vld [vmem:[#allocation8 + $0x60] sm:$0xff]  ;;  %v1307_v17 = vld [vmem:[#allocation8 + $0x58] sm:$0xff]  ;;  %v1298_v18 = vld [vmem:[#allocation8 + $0x10] sm:$0xff] }
  0x1c   :  { %643 = vmatpush.bf16.msra.mxu3 %v1310_v3  ;;  %v1284_v14 = vld [vmem:[#allocation7 + $0x20] sm:$0xff]  ;;  %v1283_v19 = vld [vmem:[#allocation7 + $0x18] sm:$0xff]  ;;  %v1306_v21 = vld [vmem:[#allocation8 + $0x50] sm:$0xff] }
  0x1d   :  { %364 = vmatpush.bf16.msra.mxu0 %v1286_v6  ;;  %v1292_v15 = vld [vmem:[#allocation7 + $0x60] sm:$0xff]  ;;  %v1291_v20 = vld [vmem:[#allocation7 + $0x58] sm:$0xff]  ;;  %v1611_v23 = vld [vmem:[#allocation2 + $0x8] sm:$0xff] }
  0x1e   :  { %413 = vmatpush.bf16.msra.mxu1 %v1294_v7  ;;  %v1609_v22 = vld [vmem:[#allocation2] sm:$0xff]  ;;  %v104_v25 = vpack.c.bf16 %v1611_v23, %v1611_v23  ;;  %v1282_v26 = vld [vmem:[#allocation7 + $0x10] sm:$0xff]  ;;  %v1297_v28 = vld [vmem:[#allocation8 + $0x8] sm:$0xff] }
  0x1f   :  { %595 = vmatpush.bf16.msra.mxu2 %v1301_v8  ;;  %v103_v24 = vpack.c.bf16 %v1609_v22, %v1609_v22  ;;  %v1290_v27 = vld [vmem:[#allocation7 + $0x50] sm:$0xff]  ;;  %v1305_v29 = vld [vmem:[#allocation8 + $0x48] sm:$0xff]  ;;  %v1296_v34 = vld [vmem:[#allocation8] sm:$0xff] }
  0x20   :  { %644 = vmatpush.bf16.msra.mxu3 %v1309_v9  ;;  %v152_v31 = vunpack.c.l.b16 %v104_v25  ;;  %v1281_v32 = vld [vmem:[#allocation7 + $0x8] sm:$0xff]  ;;  %v1304_v35 = vld [vmem:[#allocation8 + $0x40] sm:$0xff]  ;;  %v1617_v40 = vld [vmem:[#allocation2 + $0x10] sm:$0xff] }
  0x21   :  { %365 = vmatpush.bf16.msra.mxu0 %v1285_v10  ;;  %v151_v30 = vunpack.c.l.b16 %v103_v24  ;;  %v1289_v33 = vld [vmem:[#allocation7 + $0x48] sm:$0xff]  ;;  %v1272_v37 = vld [vmem:[#allocation5] sm:$0xff]  ;;  %v1619_v41 = vld [vmem:[#allocation2 + $0x18] sm:$0xff]  ;;  %v105_v42 = vpack.c.bf16 %v1617_v40, %v1617_v40 }
  0x22   :  { %414 = vmatpush.bf16.msra.mxu1 %v1293_v11  ;;  %v1280_v38 = vld [vmem:[#allocation7] sm:$0xff]  ;;  %v106_v43 = vpack.c.bf16 %v1619_v41, %v1619_v41  ;;  %v1273_v47 = vld [vmem:[#allocation5 + $0x8] sm:$0xff]  ;;  %v1274_v55 = vld [vmem:[#allocation5 + $0x10] sm:$0xff] }
  0x23   :  { %596 = vmatpush.bf16.msra.mxu2 %v1300_v12  ;;  %v167_v36 = vpack.c.b16 %v152_v31, %v151_v30  ;;  %v1288_v39 = vld [vmem:[#allocation7 + $0x40] sm:$0xff]  ;;  %v153_v44 = vunpack.c.l.b16 %v105_v42  ;;  %v1627_v49 = vld [vmem:[#allocation2 + $0x28] sm:$0xff]  ;;  %v1633_v56 = vld [vmem:[#allocation2 + $0x30] sm:$0xff] }
  0x24   :  { %645 = vmatpush.bf16.msra.mxu3 %v1308_v13  ;;  %v154_v45 = vunpack.c.l.b16 %v106_v43  ;;  %v1625_v48 = vld [vmem:[#allocation2 + $0x20] sm:$0xff]  ;;  %v108_v51 = vpack.c.bf16 %v1627_v49, %v1627_v49  ;;  %v1635_v57 = vld [vmem:[#allocation2 + $0x38] sm:$0xff]  ;;  %v109_v58 = vpack.c.bf16 %v1633_v56, %v1633_v56  ;;  %v1643_v1 = vld [vmem:[#allocation2 + $0x48] sm:$0xff] }
  0x25   :  { %366 = vmatpush.bf16.msra.mxu0 %v1284_v14  ;;  %v107_v50 = vpack.c.bf16 %v1625_v48, %v1625_v48  ;;  %v110_v59 = vpack.c.bf16 %v1635_v57, %v1635_v57  ;;  %v1275_v63 = vld [vmem:[#allocation5 + $0x18] sm:$0xff]  ;;  %v1641_v0 = vld [vmem:[#allocation2 + $0x40] sm:$0xff]  ;;  %v112_v3 = vpack.c.bf16 %v1643_v1, %v1643_v1  ;;  %v1649_v8 = vld [vmem:[#allocation2 + $0x50] sm:$0xff] }
  0x26   :  { %415 = vmatpush.bf16.msra.mxu1 %v1292_v15  ;;  %v168_v46 = vpack.c.b16 %v154_v45, %v153_v44  ;;  %v156_v53 = vunpack.c.l.b16 %v108_v51  ;;  %v157_v60 = vunpack.c.l.b16 %v109_v58  ;;  %v111_v2 = vpack.c.bf16 %v1641_v0, %v1641_v0  ;;  %v1276_v7 = vld [vmem:[#allocation5 + $0x20] sm:$0xff]  ;;  %v1651_v9 = vld [vmem:[#allocation2 + $0x58] sm:$0xff]  ;;  %v1277_v15 = vld [vmem:[#allocation5 + $0x28] sm:$0xff] }
  0x27   :  { %597 = vmatpush.bf16.msra.mxu2 %v1299_v16  ;;  %v155_v52 = vunpack.c.l.b16 %v107_v50  ;;  %v158_v61 = vunpack.c.l.b16 %v110_v59  ;;  %v160_v5 = vunpack.c.l.b16 %v112_v3  ;;  %v113_v10 = vpack.c.bf16 %v1649_v8, %v1649_v8  ;;  %v1657_v16 = vld [vmem:[#allocation2 + $0x60] sm:$0xff]  ;;  %v1278_v25 = vld [vmem:[#allocation5 + $0x30] sm:$0xff] }
  0x28   :  { %646 = vmatpush.bf16.msra.mxu3 %v1307_v17  ;;  %v159_v4 = vunpack.c.l.b16 %v111_v2  ;;  %v114_v11 = vpack.c.bf16 %v1651_v9, %v1651_v9  ;;  %v1659_v17 = vld [vmem:[#allocation2 + $0x68] sm:$0xff] }
  0x29   :  { %367 = vmatpush.bf16.msra.mxu0 %v1283_v19  ;;  %v169_v54 = vpack.c.b16 %v156_v53, %v155_v52  ;;  %v170_v62 = vpack.c.b16 %v158_v61, %v157_v60  ;;  %v161_v12 = vunpack.c.l.b16 %v113_v10  ;;  %v116_v19 = vpack.c.bf16 %v1659_v17, %v1659_v17 }
  0x2a   :  { %416 = vmatpush.bf16.msra.mxu1 %v1291_v20  ;;  %v171_v6 = vpack.c.b16 %v160_v5, %v159_v4  ;;  %v162_v13 = vunpack.c.l.b16 %v114_v11 }
  0x2b   :  { %598 = vmatpush.bf16.msra.mxu2 %v1298_v18  ;;  %v115_v18 = vpack.c.bf16 %v1657_v16, %v1657_v16 }
  0x2c   :  { %647 = vmatpush.bf16.msra.mxu3 %v1306_v21  ;;  %v172_v14 = vpack.c.b16 %v162_v13, %v161_v12  ;;  %v164_v21 = vunpack.c.l.b16 %v116_v19 }
  0x2d   :  { %368 = vmatpush.bf16.msra.mxu0 %v1282_v26  ;;  %v163_v20 = vunpack.c.l.b16 %v115_v18  ;;  %v101_v26 = vld [vmem:[#allocation2 + $0x70] sm:$0xff] }
  0x2e   :  { %417 = vmatpush.bf16.msra.mxu1 %v1290_v27  ;;  %v102_v27 = vld [vmem:[#allocation2 + $0x78] sm:$0xff] }
  0x2f   :  { %599 = vmatpush.bf16.msra.mxu2 %v1297_v28  ;;  %v173_v24 = vpack.c.b16 %v164_v21, %v163_v20  ;;  %v117_v28 = vpack.c.bf16 %v101_v26, %v101_v26 }
  0x30   :  { %648 = vmatpush.bf16.msra.mxu3 %v1305_v29  ;;  %v118_v29 = vpack.c.bf16 %v102_v27, %v102_v27 }
  0x31   :  { %369 = vmatpush.bf16.msra.mxu0 %v1281_v32  ;;  %v165_v30 = vunpack.c.l.b16 %v117_v28 }
  0x32   :  { %418 = vmatpush.bf16.msra.mxu1 %v1289_v33  ;;  %v166_v31 = vunpack.c.l.b16 %v118_v29  ;;  %v1279_v33 = vld [vmem:[#allocation5 + $0x38] sm:$0xff] }
  0x33   :  { %600 = vmatpush.bf16.msra.mxu2 %v1296_v34  ;;  %v1668_v34 = vld [vmem:[%s1851_s5] ss:$0 sm:$0xff] }
  0x34   :  { %649 = vmatpush.bf16.msra.mxu3 %v1304_v35  ;;  %v174_v32 = vpack.c.b16 %v166_v31, %v165_v30 }
  0x35   :  { %370 = vmatpush.bf16.msra.mxu0 %v1280_v38 }
  0x36   :  { %601 = vmatmul.bf16.vlgmr.msra.gmra.mxu2 %v167_v36  ;;  %419 = vmatpush.bf16.msra.mxu1 %v1288_v39 }
  0x37   :  { %650 = vmatmul.bf16.vlgmr.msra.gmra.mxu3 %v1272_v37 }
  0x38   :  { %371 = vmatmul.bf16.vlgmr.msra.gmra.mxu0 %v167_v36 }
  0x39   :  { %420 = vmatmul.bf16.vlgmr.msra.gmra.mxu1 %v1272_v37 }
  0x46   :  { %606 = vmatmul.bf16.gmra.mxu2 %v168_v46 }
  0x47   :  { %655 = vmatmul.bf16.gmra.mxu3 %v1273_v47 }
  0x48   :  { %376 = vmatmul.bf16.gmra.mxu0 %v168_v46  ;;  %v1674_v46 = vld [vmem:[%s1849_s3] ss:$0 sm:$0xff] }
  0x49   :  { %425 = vmatmul.bf16.gmra.mxu1 %v1273_v47 }
  0x56   :  { %611 = vmatmul.bf16.gmra.mxu2 %v169_v54 }
  0x57   :  { %660 = vmatmul.bf16.gmra.mxu3 %v1274_v55 }
  0x58   :  { %381 = vmatmul.bf16.gmra.mxu0 %v169_v54 }
  0x59   :  { %430 = vmatmul.bf16.gmra.mxu1 %v1274_v55 }
  0x66   :  { %616 = vmatmul.bf16.gmra.mxu2 %v170_v62 }
  0x67   :  { %665 = vmatmul.bf16.gmra.mxu3 %v1275_v63 }
  0x68   :  { %386 = vmatmul.bf16.gmra.mxu0 %v170_v62 }
  0x69   :  { %435 = vmatmul.bf16.gmra.mxu1 %v1275_v63 }
  0x76   :  { %621 = vmatmul.bf16.gmra.mxu2 %v171_v6 }
  0x77   :  { %670 = vmatmul.bf16.gmra.mxu3 %v1276_v7 }
  0x78   :  { %391 = vmatmul.bf16.gmra.mxu0 %v171_v6 }
  0x79   :  { %440 = vmatmul.bf16.gmra.mxu1 %v1276_v7 }
  0x86   :  { %626 = vmatmul.bf16.gmra.mxu2 %v172_v14 }
  0x87   :  { %675 = vmatmul.bf16.gmra.mxu3 %v1277_v15 }
  0x88   :  { %396 = vmatmul.bf16.gmra.mxu0 %v172_v14 }
  0x89   :  { %445 = vmatmul.bf16.gmra.mxu1 %v1277_v15 }
  0x96   :  { %631 = vmatmul.bf16.gmra.mxu2 %v173_v24 }
  0x97   :  { %680 = vmatmul.bf16.gmra.mxu3 %v1278_v25 }
  0x98   :  { %401 = vmatmul.bf16.gmra.mxu0 %v173_v24 }
  0x99   :  { %450 = vmatmul.bf16.gmra.mxu1 %v1278_v25 }
  0xa6   :  { %636 = vmatmul.bf16.gmra.mxu2 %v174_v32 }
  0xa7   :  { %685 = vmatmul.bf16.gmra.mxu3 %v1279_v33 }
  0xa8   :  { %406 = vmatmul.bf16.gmra.mxu0 %v174_v32 }
  0xa9   :  { %455 = vmatmul.bf16.gmra.mxu1 %v1279_v33 }
  0xb5   :  { %v372_v35 = vpop.f32.mrf.mxu0 }
  0xb6   :  { %v421_v36 = vpop.f32.mrf.mxu1  ;;  %v373_v53 = vadd.f32 %v1674_v46, %v372_v35 }
  0xb8   :  { %v422_v61 = vadd.f32 %v421_v36, %v373_v53 }
  0xb9   :  { %v602_v37 = vpop.f32.mrf.mxu2 }
  0xba   :  { %v651_v38 = vpop.f32.mrf.mxu3  ;;  %v603_v39 = vadd.f32 %v1668_v34, %v602_v37 }
  0xbc   :  { %v652_v42 = vadd.f32 %v651_v38, %v603_v39 }
  0xbd   :  { %v374_v44 = vpop.f32.mrf.mxu0 }
  0xbe   :  { %v1256_v43 = vmul.f32 -1.442695, %v652_v42  ;;  %v423_v45 = vpop.f32.mrf.mxu1  ;;  %v375_v6 = vadd.f32 %v1674_v46, %v374_v44 }
  0xc0   :  { %1323 = vpow2.f32 %v1256_v43  ;;  %v424_v20 = vadd.f32 %v423_v45, %v375_v6 }
  0xc1   :  { %v604_v47 = vpop.f32.mrf.mxu2 }
  0xc2   :  { %v653_v50 = vpop.f32.mrf.mxu3  ;;  %v605_v51 = vadd.f32 %v1668_v34, %v604_v47 }
  0xc4   :  { %v654_v52 = vadd.f32 %v653_v50, %v605_v51 }
  0xc5   :  { %v377_v59 = vpop.f32.mrf.mxu0 }
  0xc6   :  { %v1324_v54 = vpop.eup %1323  ;;  %v1257_v55 = vmul.f32 -1.442695, %v654_v52  ;;  %v426_v60 = vpop.f32.mrf.mxu1  ;;  %v378_v25 = vadd.f32 %v1674_v46, %v377_v59 }
  0xc7   :  { %v755_v58 = vadd.f32 1.0, %v1324_v54 }
  0xc8   :  { %1325 = vpow2.f32 %v1257_v55  ;;  %v427_v37 = vadd.f32 %v426_v60, %v378_v25 }
  0xc9   :  { %1327 = vrcp.f32 %v755_v58  ;;  %v607_v62 = vpop.f32.mrf.mxu2  ;;  %v782_v24 = vand.u32 2147483648, %v755_v58  ;;  %v780_v27 = vand.u32 2147483647, %v755_v58  ;;  %vm776_vm1 = vweird.f32 %v755_v58 }
  0xca   :  { %v656_v63 = vpop.f32.mrf.mxu3  ;;  %v608_v2 = vadd.f32 %v1668_v34, %v607_v62  ;;  %1329 = vtanh.f32 %v422_v61 }
  0xcb   :  { %v783_v35 = vor.u32 1.1754944e-38, %v782_v24  ;;  %vm781_vm3 = vcmp.eq.f32.partialorder %v780_v27, 8.507059e+37 }
  0xcc   :  { %v657_v3 = vadd.f32 %v656_v63, %v608_v2 }
  0xcd   :  { %v379_v11 = vpop.f32.mrf.mxu0 }
  0xce   :  { %v1326_v4 = vpop.eup %1325  ;;  %v1258_v5 = vmul.f32 -1.442695, %v657_v3  ;;  %v1682_v12 = vpop.f32.mrf.mxu1  ;;  %v380_v2 = vadd.f32 %v1674_v46, %v379_v11 }
  0xcf   :  { %v1328_v7 = vpop.eup %1327  ;;  %v1680_v10 = vadd.f32 1.0, %v1326_v4 }
  0xd0   :  { %v772_v13 = vmul.f32 %v1328_v7, %v755_v58  ;;  %1331 = vpow2.f32 %v1258_v5  ;;  %v1330_v18 = vpop.eup %1329  ;;  %vm777_vm0 = vweird.f32 %v1328_v7 }
  0xd1   :  { %1333 = vrcp.f32 %v1680_v10  ;;  %v609_v14 = vpop.f32.mrf.mxu2  ;;  %v1011_v29 = vsub.f32 %v1330_v18, %v1609_v22  ;;  %vm778_vm2 = vmor %vm776_vm1, %vm777_vm0  ;;  %v797_v53 = vand.u32 2147483648, %v1680_v10  ;;  %v795_v54 = vand.u32 2147483647, %v1680_v10 }
  0xd2   :  { %v658_v15 = vpop.f32.mrf.mxu3  ;;  %v773_v19 = vsub.f32 1.0, %v772_v13  ;;  %v610_v21 = vadd.f32 %v1668_v34, %v609_v14  ;;  %1335 = vtanh.f32 %v424_v20  ;;  %vm791_vm5 = vweird.f32 %v1680_v10 }
  0xd3   :  { %v798_v4 = vor.u32 1.1754944e-38, %v797_v53  ;;  %vm796_vm7 = vcmp.eq.f32.partialorder %v795_v54, 8.507059e+37 }
  0xd4   :  { %v774_v26 = vmul.f32 %v1328_v7, %v773_v19  ;;  %v659_v28 = vadd.f32 %v658_v15, %v610_v21  ;;  %v429_v21 = vadd.f32 %v1682_v12, %v380_v2 }
  0xd5   :  { %v382_v38 = vpop.f32.mrf.mxu0 }
  0xd6   :  { %v1332_v30 = vpop.eup %1331  ;;  %v775_v31 = vadd.f32 %v1328_v7, %v774_v26  ;;  %v1259_v32 = vmul.f32 -1.442695, %v659_v28  ;;  %v1690_v39 = vpop.f32.mrf.mxu1  ;;  %v383_v27 = vadd.f32 %v1674_v46, %v382_v38 }
  0xd7   :  { %v1334_v33 = vpop.eup %1333  ;;  %v1688_v36 = vadd.f32 1.0, %v1332_v30 }
  0xd8   :  { %v787_v42 = vmul.f32 %v1334_v33, %v1680_v10  ;;  %v779_v43 = vsel %vm778_vm2, %v1328_v7, %v775_v31  ;;  %1337 = vpow2.f32 %v1259_v32  ;;  %v1336_v55 = vpop.eup %1335  ;;  %vm792_vm4 = vweird.f32 %v1334_v33 }
  0xd9   :  { %v784_v44 = vsel %vm781_vm3, %v783_v35, %v779_v43  ;;  %1339 = vrcp.f32 %v1688_v36  ;;  %v612_v45 = vpop.f32.mrf.mxu2  ;;  %vm793_vm6 = vmor %vm791_vm5, %vm792_vm4  ;;  %v1012_v5 = vsub.f32 %v1336_v55, %v1611_v23  ;;  %v812_v25 = vand.u32 2147483648, %v1688_v36 }
  0xda   :  { %v661_v47 = vpop.f32.mrf.mxu3  ;;  %v788_v50 = vsub.f32 1.0, %v787_v42  ;;  %v1027_v51 = vmul.f32 %v1011_v29, %v784_v44  ;;  %v613_v52 = vadd.f32 %v1668_v34, %v612_v45  ;;  %1341 = vtanh.f32 %v427_v37 }
  0xdb   :  { %v810_v26 = vand.u32 2147483647, %v1688_v36  ;;  %vm806_vm9 = vweird.f32 %v1688_v36  ;;  %v813_v37 = vor.u32 1.1754944e-38, %v812_v25  ;;  %v432_v38 = vadd.f32 %v1690_v39, %v383_v27 }
  0xdc   :  { %v789_v58 = vmul.f32 %v1334_v33, %v788_v50  ;;  %v1043_v59 = vadd.f32 %v1027_v51, %v1609_v22  ;;  %v662_v60 = vadd.f32 %v661_v47, %v613_v52 }
  0xdd   :  { %v384_v7 = vpop.f32.mrf.mxu0  ;;  %vm811_vm11 = vcmp.eq.f32.partialorder %v810_v26, 8.507059e+37 }
  0xde   :  { %v1338_v61 = vpop.eup %1337  ;;  %1059 = vst [vmem:[#allocation10] sm:$0xff] %v1043_v59  ;;  %v790_v62 = vadd.f32 %v1334_v33, %v789_v58  ;;  %v1260_v63 = vmul.f32 -1.442695, %v662_v60  ;;  %v1703_v13 = vpop.f32.mrf.mxu1  ;;  %v385_v2 = vadd.f32 %v1674_v46, %v384_v7 }
  0xdf   :  { %v1340_v3 = vpop.eup %1339  ;;  %v1701_v6 = vadd.f32 1.0, %v1338_v61 }
  0xe0   :  { %v802_v22 = vmul.f32 %v1340_v3, %v1688_v36  ;;  %v794_v14 = vsel %vm793_vm6, %v1334_v33, %v790_v62  ;;  %1343 = vpow2.f32 %v1260_v63  ;;  %v1342_v10 = vpop.eup %1341  ;;  %vm807_vm8 = vweird.f32 %v1340_v3 }
  0xe1   :  { %v799_v15 = vsel %vm796_vm7, %v798_v4, %v794_v14  ;;  %1345 = vrcp.f32 %v1701_v6  ;;  %v614_v11 = vpop.f32.mrf.mxu2  ;;  %v1013_v31 = vsub.f32 %v1342_v10, %v1617_v40  ;;  %vm808_vm10 = vmor %vm806_vm9, %vm807_vm8  ;;  %v827_v54 = vand.u32 2147483648, %v1701_v6 }
  0xe2   :  { %v663_v18 = vpop.f32.mrf.mxu3  ;;  %v803_v19 = vsub.f32 1.0, %v802_v22  ;;  %v1028_v20 = vmul.f32 %v1012_v5, %v799_v15  ;;  %v615_v24 = vadd.f32 %v1668_v34, %v614_v11  ;;  %1347 = vtanh.f32 %v429_v21 }
  0xe3   :  { %v825_v39 = vand.u32 2147483647, %v1701_v6  ;;  %vm821_vm13 = vweird.f32 %v1701_v6  ;;  %v828_v4 = vor.u32 1.1754944e-38, %v827_v54  ;;  %v434_v21 = vadd.f32 %v1703_v13, %v385_v2 }
  0xe4   :  { %v804_v28 = vmul.f32 %v1340_v3, %v803_v19  ;;  %v1044_v29 = vadd.f32 %v1028_v20, %v1611_v23  ;;  %v664_v30 = vadd.f32 %v663_v18, %v615_v24 }
  0xe5   :  { %v387_v43 = vpop.f32.mrf.mxu0  ;;  %vm826_vm15 = vcmp.eq.f32.partialorder %v825_v39, 8.507059e+37 }
  0xe6   :  { %v1344_v32 = vpop.eup %1343  ;;  %1060 = vst [vmem:[#allocation10 + $0x8] sm:$0xff] %v1044_v29  ;;  %v805_v12 = vadd.f32 %v1340_v3, %v804_v28  ;;  %v1261_v33 = vmul.f32 -1.442695, %v664_v30  ;;  %v1718_v23 = vpop.f32.mrf.mxu1  ;;  %v388_v27 = vadd.f32 %v1674_v46, %v387_v43 }
  0xe7   :  { %v1346_v35 = vpop.eup %1345  ;;  %v1715_v42 = vadd.f32 1.0, %v1344_v32 }
  0xe8   :  { %v817_v44 = vmul.f32 %v1346_v35, %v1701_v6  ;;  %v809_v45 = vsel %vm808_vm10, %v1340_v3, %v805_v12  ;;  %1349 = vpow2.f32 %v1261_v33  ;;  %v1348_v55 = vpop.eup %1347  ;;  %vm822_vm12 = vweird.f32 %v1346_v35 }
  0xe9   :  { %v814_v36 = vsel %vm811_vm11, %v813_v37, %v809_v45  ;;  %1351 = vrcp.f32 %v1715_v42  ;;  %v617_v47 = vpop.f32.mrf.mxu2  ;;  %vm823_vm14 = vmor %vm821_vm13, %vm822_vm12  ;;  %v1014_v5 = vsub.f32 %v1348_v55, %v1619_v41  ;;  %v842_v25 = vand.u32 2147483648, %v1715_v42 }
  0xea   :  { %v666_v50 = vpop.f32.mrf.mxu3  ;;  %v818_v51 = vsub.f32 1.0, %v817_v44  ;;  %v1029_v52 = vmul.f32 %v1013_v31, %v814_v36  ;;  %v618_v53 = vadd.f32 %v1668_v34, %v617_v47  ;;  %1353 = vtanh.f32 %v432_v38 }
  0xeb   :  { %v840_v26 = vand.u32 2147483647, %v1715_v42  ;;  %vm836_vm1 = vweird.f32 %v1715_v42  ;;  %v437_v38 = vadd.f32 %v1718_v23, %v388_v27 }
  0xec   :  { %v819_v58 = vmul.f32 %v1346_v35, %v818_v51  ;;  %v1045_v59 = vadd.f32 %v1029_v52, %v1617_v40  ;;  %v667_v60 = vadd.f32 %v666_v50, %v618_v53 }
  0xed   :  { %v389_v14 = vpop.f32.mrf.mxu0  ;;  %vm841_vm3 = vcmp.eq.f32.partialorder %v840_v26, 8.507059e+37 }
  0xee   :  { %v1350_v61 = vpop.eup %1349  ;;  %1061 = vst [vmem:[#allocation10 + $0x10] sm:$0xff] %v1045_v59  ;;  %v820_v62 = vadd.f32 %v1346_v35, %v819_v58  ;;  %v1262_v63 = vmul.f32 -1.442695, %v667_v60  ;;  %v1732_v15 = vpop.f32.mrf.mxu1 }
  0xef   :  { %v1352_v3 = vpop.eup %1351  ;;  %v1729_v22 = vadd.f32 1.0, %v1350_v61 }
  0xf0   :  { %v832_v40 = vmul.f32 %v1352_v3, %v1715_v42  ;;  %v824_v10 = vsel %vm823_vm14, %v1346_v35, %v820_v62  ;;  %1355 = vpow2.f32 %v1262_v63  ;;  %v1354_v6 = vpop.eup %1353  ;;  %vm837_vm0 = vweird.f32 %v1352_v3 }
  0xf1   :  { %v829_v11 = vsel %vm826_vm15, %v828_v4, %v824_v10  ;;  %1357 = vrcp.f32 %v1729_v22  ;;  %v619_v7 = vpop.f32.mrf.mxu2  ;;  %v1015_v31 = vsub.f32 %v1354_v6, %v1625_v48  ;;  %vm838_vm2 = vmor %vm836_vm1, %vm837_vm0  ;;  %v843_v35 = vor.u32 1.1754944e-38, %v842_v25 }
  0xf2   :  { %v668_v18 = vpop.f32.mrf.mxu3  ;;  %v833_v19 = vsub.f32 1.0, %v832_v40  ;;  %v1030_v20 = vmul.f32 %v1014_v5, %v829_v11  ;;  %v620_v24 = vadd.f32 %v1668_v34, %v619_v7  ;;  %1359 = vtanh.f32 %v434_v21 }
  0xf3   :  { %v857_v53 = vand.u32 2147483648, %v1729_v22  ;;  %v855_v23 = vand.u32 2147483647, %v1729_v22  ;;  %vm851_vm5 = vweird.f32 %v1729_v22  ;;  %v390_v62 = vadd.f32 %v1674_v46, %v389_v14 }
  0xf4   :  { %v834_v28 = vmul.f32 %v1352_v3, %v833_v19  ;;  %v1046_v29 = vadd.f32 %v1030_v20, %v1619_v41  ;;  %v669_v30 = vadd.f32 %v668_v18, %v620_v24 }
  0xf5   :  { %v392_v43 = vpop.f32.mrf.mxu0  ;;  %v858_v2 = vor.u32 1.1754944e-38, %v857_v53  ;;  %vm856_vm7 = vcmp.eq.f32.partialorder %v855_v23, 8.507059e+37  ;;  %v439_v18 = vadd.f32 %v1732_v15, %v390_v62 }
  0xf6   :  { %v1356_v32 = vpop.eup %1355  ;;  %1062 = vst [vmem:[#allocation10 + $0x18] sm:$0xff] %v1046_v29  ;;  %v835_v13 = vadd.f32 %v1352_v3, %v834_v28  ;;  %v1263_v12 = vmul.f32 -1.442695, %v669_v30  ;;  %v441_v52 = vpop.f32.mrf.mxu1  ;;  %v393_v24 = vadd.f32 %v1674_v46, %v392_v43 }
  0xf7   :  { %v1358_v33 = vpop.eup %1357  ;;  %v1743_v37 = vadd.f32 1.0, %v1356_v32 }
  0xf8   :  { %v847_v41 = vmul.f32 %v1358_v33, %v1729_v22  ;;  %v839_v44 = vsel %vm838_vm2, %v1352_v3, %v835_v13  ;;  %1361 = vpow2.f32 %v1263_v12  ;;  %v1360_v54 = vpop.eup %1359  ;;  %vm852_vm4 = vweird.f32 %v1358_v33 }
  0xf9   :  { %v844_v45 = vsel %vm841_vm3, %v843_v35, %v839_v44  ;;  %1363 = vrcp.f32 %v1743_v37  ;;  %v622_v42 = vpop.f32.mrf.mxu2  ;;  %vm853_vm6 = vmor %vm851_vm5, %vm852_vm4  ;;  %v1016_v3 = vsub.f32 %v1360_v54, %v1627_v49  ;;  %v872_v20 = vand.u32 2147483648, %v1743_v37 }
  0xfa   :  { %v671_v36 = vpop.f32.mrf.mxu3  ;;  %v848_v47 = vsub.f32 1.0, %v847_v41  ;;  %v1031_v50 = vmul.f32 %v1015_v31, %v844_v45  ;;  %v623_v51 = vadd.f32 %v1668_v34, %v622_v42  ;;  %1365 = vtanh.f32 %v437_v38 }
  0xfb   :  { %v870_v21 = vand.u32 2147483647, %v1743_v37  ;;  %vm866_vm9 = vweird.f32 %v1743_v37  ;;  %v873_v13 = vor.u32 1.1754944e-38, %v872_v20 }
  0xfc   :  { %v849_v39 = vmul.f32 %v1358_v33, %v848_v47  ;;  %v1047_v55 = vadd.f32 %v1031_v50, %v1625_v48  ;;  %v672_v58 = vadd.f32 %v671_v36, %v623_v51 }
  0xfd   :  { %v394_v40 = vpop.f32.mrf.mxu0  ;;  %vm871_vm11 = vcmp.eq.f32.partialorder %v870_v21, 8.507059e+37 }
  0xfe   :  { %v1362_v59 = vpop.eup %1361  ;;  %1063 = vst [vmem:[#allocation10 + $0x20] sm:$0xff] %v1047_v55  ;;  %v850_v60 = vadd.f32 %v1358_v33, %v849_v39  ;;  %v1264_v61 = vmul.f32 -1.442695, %v672_v58  ;;  %v443_v28 = vpop.f32.mrf.mxu1  ;;  %v395_v55 = vadd.f32 %v1674_v46, %v394_v40 }
  0xff   :  { %v1364_v63 = vpop.eup %1363  ;;  %v1755_v4 = vadd.f32 1.0, %v1362_v59 }
 0x100   :  { %v862_v5 = vmul.f32 %v1364_v63, %v1743_v37  ;;  %v854_v48 = vsel %vm853_vm6, %v1358_v33, %v850_v60  ;;  %1367 = vpow2.f32 %v1264_v61  ;;  %v1366_v10 = vpop.eup %1365  ;;  %vm867_vm8 = vweird.f32 %v1364_v63 }
 0x101   :  { %v859_v22 = vsel %vm856_vm7, %v858_v2, %v854_v48  ;;  %1369 = vrcp.f32 %v1755_v4  ;;  %v624_v6 = vpop.f32.mrf.mxu2  ;;  %v1017_v29 = vsub.f32 %v1366_v10, %v1633_v56  ;;  %vm868_vm10 = vmor %vm866_vm9, %vm867_vm8  ;;  %v442_v33 = vadd.f32 %v441_v52, %v393_v24 }
 0x102   :  { %v673_v11 = vpop.f32.mrf.mxu3  ;;  %v863_v14 = vsub.f32 1.0, %v862_v5  ;;  %v1032_v7 = vmul.f32 %v1016_v3, %v859_v22  ;;  %v625_v19 = vadd.f32 %v1668_v34, %v624_v6  ;;  %1371 = vtanh.f32 %v439_v18 }
 0x103   :  { %v887_v36 = vand.u32 2147483648, %v1755_v4  ;;  %v885_v47 = vand.u32 2147483647, %v1755_v4  ;;  %vm881_vm13 = vweird.f32 %v1755_v4  ;;  %v444_v10 = vadd.f32 %v443_v28, %v395_v55 }
 0x104   :  { %v864_v25 = vmul.f32 %v1364_v63, %v863_v14  ;;  %v1048_v26 = vadd.f32 %v1032_v7, %v1627_v49  ;;  %v674_v27 = vadd.f32 %v673_v11, %v625_v19 }
 0x105   :  { %v397_v42 = vpop.f32.mrf.mxu0  ;;  %v888_v60 = vor.u32 1.1754944e-38, %v887_v36  ;;  %vm886_vm15 = vcmp.eq.f32.partialorder %v885_v47, 8.507059e+37 }
 0x106   :  { %v1368_v30 = vpop.eup %1367  ;;  %1064 = vst [vmem:[#allocation10 + $0x28] sm:$0xff] %v1048_v26  ;;  %v865_v15 = vadd.f32 %v1364_v63, %v864_v25  ;;  %v1265_v31 = vmul.f32 -1.442695, %v674_v27  ;;  %v446_v58 = vpop.f32.mrf.mxu1  ;;  %v398_v14 = vadd.f32 %v1674_v46, %v397_v42 }
 0x107   :  { %v1370_v32 = vpop.eup %1369  ;;  %v1767_v12 = vadd.f32 1.0, %v1368_v30 }
 0x108   :  { %v877_v49 = vmul.f32 %v1370_v32, %v1755_v4  ;;  %v869_v35 = vsel %vm868_vm10, %v1364_v63, %v865_v15  ;;  %1373 = vpow2.f32 %v1265_v31  ;;  %v1372_v50 = vpop.eup %1371  ;;  %vm882_vm12 = vweird.f32 %v1370_v32 }
 0x109   :  { %v874_v38 = vsel %vm871_vm11, %v873_v13, %v869_v35  ;;  %1375 = vrcp.f32 %v1767_v12  ;;  %v627_v43 = vpop.f32.mrf.mxu2  ;;  %vm883_vm14 = vmor %vm881_vm13, %vm882_vm12  ;;  %v1018_v61 = vsub.f32 %v1372_v50, %v1635_v57  ;;  %v902_v6 = vand.u32 2147483648, %v1767_v12 }
 0x10a   :  { %v676_v37 = vpop.f32.mrf.mxu3  ;;  %v878_v41 = vsub.f32 1.0, %v877_v49  ;;  %v1033_v44 = vmul.f32 %v1017_v29, %v874_v38  ;;  %v628_v45 = vadd.f32 %v1668_v34, %v627_v43  ;;  %1377 = vtanh.f32 %v442_v33 }
 0x10b   :  { %v900_v11 = vand.u32 2147483647, %v1767_v12  ;;  %vm896_vm1 = vweird.f32 %v1767_v12  ;;  %v903_v28 = vor.u32 1.1754944e-38, %v902_v6  ;;  %v447_v30 = vadd.f32 %v446_v58, %v398_v14 }
 0x10c   :  { %v879_v51 = vmul.f32 %v1370_v32, %v878_v41  ;;  %v1049_v52 = vadd.f32 %v1033_v44, %v1633_v56  ;;  %v677_v53 = vadd.f32 %v676_v37, %v628_v45 }
 0x10d   :  { %v399_v20 = vpop.f32.mrf.mxu0  ;;  %vm901_vm3 = vcmp.eq.f32.partialorder %v900_v11, 8.507059e+37 }
 0x10e   :  { %v1374_v23 = vpop.eup %1373  ;;  %1065 = vst [vmem:[#allocation10 + $0x30] sm:$0xff] %v1049_v52  ;;  %v880_v54 = vadd.f32 %v1370_v32, %v879_v51  ;;  %v1266_v39 = vmul.f32 -1.442695, %v677_v53  ;;  %v448_v31 = vpop.f32.mrf.mxu1  ;;  %v400_v50 = vadd.f32 %v1674_v46, %v399_v20 }
 0x10f   :  { %v1376_v59 = vpop.eup %1375  ;;  %v1778_v62 = vadd.f32 1.0, %v1374_v23 }
 0x110   :  { %v892_v56 = vmul.f32 %v1376_v59, %v1767_v12  ;;  %v884_v63 = vsel %vm883_vm14, %v1370_v32, %v880_v54  ;;  %1379 = vpow2.f32 %v1266_v39  ;;  %v1378_v2 = vpop.eup %1377  ;;  %vm897_vm0 = vweird.f32 %v1376_v59 }
 0x111   :  { %v889_v3 = vsel %vm886_vm15, %v888_v60, %v884_v63  ;;  %1381 = vrcp.f32 %v1778_v62  ;;  %v629_v4 = vpop.f32.mrf.mxu2  ;;  %v1019_v21 = vsub.f32 %v1378_v2, %v1641_v0  ;;  %vm898_vm2 = vmor %vm896_vm1, %vm897_vm0  ;;  %v917_v38 = vand.u32 2147483648, %v1778_v62 }
 0x112   :  { %v678_v5 = vpop.f32.mrf.mxu3  ;;  %v893_v48 = vsub.f32 1.0, %v892_v56  ;;  %v1034_v40 = vmul.f32 %v1018_v61, %v889_v3  ;;  %v630_v22 = vadd.f32 %v1668_v34, %v629_v4  ;;  %1383 = vtanh.f32 %v444_v10 }
 0x113   :  { %v915_v43 = vand.u32 2147483647, %v1778_v62  ;;  %vm911_vm5 = vweird.f32 %v1778_v62  ;;  %v918_v53 = vor.u32 1.1754944e-38, %v917_v38  ;;  %v449_v56 = vadd.f32 %v448_v31, %v400_v50 }
 0x114   :  { %v894_v7 = vmul.f32 %v1376_v59, %v893_v48  ;;  %v1050_v18 = vadd.f32 %v1034_v40, %v1635_v57  ;;  %v679_v19 = vadd.f32 %v678_v5, %v630_v22 }
 0x115   :  { %v402_v51 = vpop.f32.mrf.mxu0  ;;  %vm916_vm7 = vcmp.eq.f32.partialorder %v915_v43, 8.507059e+37 }
 0x116   :  { %v1380_v24 = vpop.eup %1379  ;;  %1066 = vst [vmem:[#allocation10 + $0x38] sm:$0xff] %v1050_v18  ;;  %v895_v25 = vadd.f32 %v1376_v59, %v894_v7  ;;  %v1267_v26 = vmul.f32 -1.442695, %v679_v19  ;;  %v451_v2 = vpop.f32.mrf.mxu1  ;;  %v403_v22 = vadd.f32 %v1674_v46, %v402_v51 }
 0x117   :  { %v1382_v27 = vpop.eup %1381  ;;  %v1789_v29 = vadd.f32 1.0, %v1380_v24 }
 0x118   :  { %v907_v57 = vmul.f32 %v1382_v27, %v1778_v62  ;;  %v899_v15 = vsel %vm898_vm2, %v1376_v59, %v895_v25  ;;  %1385 = vpow2.f32 %v1267_v26  ;;  %v1384_v37 = vpop.eup %1383  ;;  %vm912_vm4 = vweird.f32 %v1382_v27 }
 0x119   :  { %v904_v32 = vsel %vm901_vm3, %v903_v28, %v899_v15  ;;  %1387 = vrcp.f32 %v1789_v29  ;;  %v632_v13 = vpop.f32.mrf.mxu2  ;;  %vm913_vm6 = vmor %vm911_vm5, %vm912_vm4  ;;  %v1020_v23 = vsub.f32 %v1384_v37, %v1643_v1  ;;  %v932_v3 = vand.u32 2147483648, %v1789_v29 }
 0x11a   :  { %v681_v12 = vpop.f32.mrf.mxu3  ;;  %v908_v33 = vsub.f32 1.0, %v907_v57  ;;  %v1035_v49 = vmul.f32 %v1019_v21, %v904_v32  ;;  %v633_v35 = vadd.f32 %v1668_v34, %v632_v13  ;;  %1389 = vtanh.f32 %v447_v30 }
 0x11b   :  { %v930_v4 = vand.u32 2147483647, %v1789_v29  ;;  %vm926_vm9 = vweird.f32 %v1789_v29  ;;  %v933_v18 = vor.u32 1.1754944e-38, %v932_v3  ;;  %v452_v25 = vadd.f32 %v451_v2, %v403_v22 }
 0x11c   :  { %v909_v41 = vmul.f32 %v1382_v27, %v908_v33  ;;  %v1051_v44 = vadd.f32 %v1035_v49, %v1641_v0  ;;  %v682_v45 = vadd.f32 %v681_v12, %v633_v35 }
 0x11d   :  { %vm931_vm11 = vcmp.eq.f32.partialorder %v930_v4, 8.507059e+37  ;;  %v404_v21 = vpop.f32.mrf.mxu0 }
 0x11e   :  { %v1386_v42 = vpop.eup %1385  ;;  %1067 = vst [vmem:[#allocation10 + $0x40] sm:$0xff] %v1051_v44  ;;  %v910_v36 = vadd.f32 %v1382_v27, %v909_v41  ;;  %v1268_v47 = vmul.f32 -1.442695, %v682_v45  ;;  %v453_v33 = vpop.f32.mrf.mxu1  ;;  %v405_v45 = vadd.f32 %v1674_v46, %v404_v21 }
 0x11f   :  { %v1388_v52 = vpop.eup %1387  ;;  %v1800_v54 = vadd.f32 1.0, %v1386_v42 }
 0x120   :  { %v922_v0 = vmul.f32 %v1388_v52, %v1789_v29  ;;  %v914_v39 = vsel %vm913_vm6, %v1382_v27, %v910_v36  ;;  %1391 = vpow2.f32 %v1268_v47  ;;  %v1390_v55 = vpop.eup %1389  ;;  %vm927_vm8 = vweird.f32 %v1388_v52 }
 0x121   :  { %v919_v58 = vsel %vm916_vm7, %v918_v53, %v914_v39  ;;  %1393 = vrcp.f32 %v1800_v54  ;;  %v634_v59 = vpop.f32.mrf.mxu2  ;;  %v1021_v10 = vsub.f32 %v1390_v55, %v1649_v8  ;;  %vm928_vm10 = vmor %vm926_vm9, %vm927_vm8  ;;  %v947_v57 = vand.u32 2147483648, %v1800_v54 }
 0x122   :  { %v683_v60 = vpop.f32.mrf.mxu3  ;;  %v923_v61 = vsub.f32 1.0, %v922_v0  ;;  %v1036_v62 = vmul.f32 %v1020_v23, %v919_v58  ;;  %v635_v63 = vadd.f32 %v1668_v34, %v634_v59  ;;  %1395 = vtanh.f32 %v449_v56 }
 0x123   :  { %v945_v15 = vand.u32 2147483647, %v1800_v54  ;;  %vm941_vm13 = vweird.f32 %v1800_v54  ;;  %v948_v37 = vor.u32 1.1754944e-38, %v947_v57  ;;  %v454_v39 = vadd.f32 %v453_v33, %v405_v45 }
 0x124   :  { %v924_v5 = vmul.f32 %v1388_v52, %v923_v61  ;;  %v1052_v48 = vadd.f32 %v1036_v62, %v1643_v1  ;;  %v684_v40 = vadd.f32 %v683_v60, %v635_v63 }
 0x125   :  { %vm946_vm15 = vcmp.eq.f32.partialorder %v945_v15, 8.507059e+37  ;;  %v407_v53 = vpop.f32.mrf.mxu0 }
 0x126   :  { %v1392_v6 = vpop.eup %1391  ;;  %1068 = vst [vmem:[#allocation10 + $0x48] sm:$0xff] %v1052_v48  ;;  %v925_v11 = vadd.f32 %v1388_v52, %v924_v5  ;;  %v1269_v14 = vmul.f32 -1.442695, %v684_v40  ;;  %v408_v61 = vadd.f32 %v1674_v46, %v407_v53  ;;  %v456_v2 = vpop.f32.mrf.mxu1 }
 0x127   :  { %v1394_v7 = vpop.eup %1393  ;;  %v1811_v19 = vadd.f32 1.0, %v1392_v6 }
 0x128   :  { %v937_v1 = vmul.f32 %v1394_v7, %v1800_v54  ;;  %v929_v20 = vsel %vm928_vm10, %v1388_v52, %v925_v11  ;;  %1397 = vpow2.f32 %v1269_v14  ;;  %v1396_v31 = vpop.eup %1395  ;;  %vm942_vm12 = vweird.f32 %v1394_v7 }
 0x129   :  { %v934_v24 = vsel %vm931_vm11, %v933_v18, %v929_v20  ;;  %1399 = vrcp.f32 %v1811_v19  ;;  %v637_v26 = vpop.f32.mrf.mxu2  ;;  %vm943_vm14 = vmor %vm941_vm13, %vm942_vm12  ;;  %v1022_v41 = vsub.f32 %v1396_v31, %v1651_v9  ;;  %v962_v54 = vand.u32 2147483648, %v1811_v19 }
 0x12a   :  { %v686_v27 = vpop.f32.mrf.mxu3  ;;  %v938_v28 = vsub.f32 1.0, %v937_v1  ;;  %v1037_v29 = vmul.f32 %v1021_v10, %v934_v24  ;;  %v638_v30 = vadd.f32 %v1668_v34, %v637_v26  ;;  %1401 = vtanh.f32 %v452_v25 }
 0x12b   :  { %v960_v0 = vand.u32 2147483647, %v1811_v19  ;;  %vm956_vm1 = vweird.f32 %v1811_v19  ;;  %v963_v4 = vor.u32 1.1754944e-38, %v962_v54  ;;  %v457_v10 = vadd.f32 %v456_v2, %v408_v61 }
 0x12c   :  { %v939_v32 = vmul.f32 %v1394_v7, %v938_v28  ;;  %v1053_v13 = vadd.f32 %v1037_v29, %v1649_v8  ;;  %v687_v12 = vadd.f32 %v686_v27, %v638_v30 }
 0x12d   :  { %vm961_vm3 = vcmp.eq.f32.partialorder %v960_v0, 8.507059e+37 }
 0x12e   :  { %v1398_v49 = vpop.eup %1397  ;;  %1069 = vst [vmem:[#allocation10 + $0x50] sm:$0xff] %v1053_v13  ;;  %v940_v35 = vadd.f32 %v1394_v7, %v939_v32  ;;  %v1270_v38 = vmul.f32 -1.442695, %v687_v12  ;;  %v458_v30 = vpop.f32.mrf.mxu1 }
 0x12f   :  { %v1400_v43 = vpop.eup %1399  ;;  %v1821_v44 = vadd.f32 1.0, %v1398_v49  ;;  %v1419_v49 = vld [vmem:[#allocation2 + $0x68] sm:$0xff] }
 0x130   :  { %v952_v8 = vmul.f32 %v1400_v43, %v1811_v19  ;;  %v944_v42 = vsel %vm943_vm14, %v1394_v7, %v940_v35  ;;  %1403 = vpow2.f32 %v1270_v38  ;;  %v1402_v23 = vpop.eup %1401  ;;  %vm957_vm0 = vweird.f32 %v1400_v43  ;;  %v409_v19 = vpop.f32.mrf.mxu0 }
 0x131   :  { %v949_v36 = vsel %vm946_vm15, %v948_v37, %v944_v42  ;;  %1405 = vrcp.f32 %v1821_v44  ;;  %v639_v47 = vpop.f32.mrf.mxu2  ;;  %v1023_v56 = vsub.f32 %v1402_v23, %v1657_v16  ;;  %vm958_vm2 = vmor %vm956_vm1, %vm957_vm0  ;;  %v977_v11 = vand.u32 2147483648, %v1821_v44 }
 0x132   :  { %v953_v50 = vsub.f32 1.0, %v952_v8  ;;  %v1038_v51 = vmul.f32 %v1022_v41, %v949_v36  ;;  %v640_v52 = vadd.f32 %v1668_v34, %v639_v47  ;;  %v688_v55 = vpop.f32.mrf.mxu3  ;;  %1407 = vtanh.f32 %v454_v39  ;;  %v1421_v39 = vld [vmem:[#allocation2 + $0x78] sm:$0xff] }
 0x133   :  { %v975_v18 = vand.u32 2147483647, %v1821_v44  ;;  %vm971_vm5 = vweird.f32 %v1821_v44  ;;  %v978_v25 = vor.u32 1.1754944e-38, %v977_v11  ;;  %v410_v27 = vadd.f32 %v1674_v46, %v409_v19 }
 0x134   :  { %v954_v58 = vmul.f32 %v1400_v43, %v953_v50  ;;  %v1054_v59 = vadd.f32 %v1038_v51, %v1651_v9  ;;  %v689_v60 = vadd.f32 %v688_v55, %v640_v52 }
 0x135   :  { %vm976_vm7 = vcmp.eq.f32.partialorder %v975_v18, 8.507059e+37  ;;  %v459_v12 = vadd.f32 %v458_v30, %v410_v27 }
 0x136   :  { %v1404_v62 = vpop.eup %1403  ;;  %1070 = vst [vmem:[#allocation10 + $0x58] sm:$0xff] %v1054_v59  ;;  %v955_v34 = vadd.f32 %v1400_v43, %v954_v58  ;;  %v1271_v63 = vmul.f32 -1.442695, %v689_v60 }
 0x137   :  { %v1406_v3 = vpop.eup %1405  ;;  %v769_v5 = vadd.f32 1.0, %v1404_v62 }
 0x138   :  { %v967_v9 = vmul.f32 %v1406_v3, %v1821_v44  ;;  %v959_v48 = vsel %vm958_vm2, %v1400_v43, %v955_v34  ;;  %1409 = vpow2.f32 %v1271_v63  ;;  %vm972_vm4 = vweird.f32 %v1406_v3  ;;  %v1408_v1 = vpop.eup %1407  ;;  %v1420_v43 = vld [vmem:[#allocation2 + $0x70] sm:$0xff] }
 0x139   :  { %v964_v40 = vsel %vm961_vm3, %v963_v4, %v959_v48  ;;  %1411 = vrcp.f32 %v769_v5  ;;  %vm973_vm6 = vmor %vm971_vm5, %vm972_vm4  ;;  %v992_v13 = vand.u32 2147483648, %v769_v5  ;;  %v990_v38 = vand.u32 2147483647, %v769_v5 }
 0x13a   :  { %v968_v22 = vsub.f32 1.0, %v967_v9  ;;  %v1039_v6 = vmul.f32 %v1023_v56, %v964_v40  ;;  %1413 = vtanh.f32 %v457_v10  ;;  %vm986_vm9 = vweird.f32 %v769_v5 }
 0x13b   :  { %vm991_vm11 = vcmp.eq.f32.partialorder %v990_v38, 8.507059e+37 }
 0x13c   :  { %v969_v14 = vmul.f32 %v1406_v3, %v968_v22  ;;  %v1055_v7 = vadd.f32 %v1039_v6, %v1657_v16  ;;  %v1024_v16 = vsub.f32 %v1408_v1, %v1659_v17  ;;  %v993_v17 = vor.u32 1.1754944e-38, %v992_v13 }
 0x13e   :  { %v1410_v20 = vpop.eup %1409  ;;  %1071 = vst [vmem:[#allocation10 + $0x60] sm:$0xff] %v1055_v7  ;;  %v970_v21 = vadd.f32 %v1406_v3, %v969_v14 }
 0x13f   :  { %v1412_v24 = vpop.eup %1411  ;;  %v770_v26 = vadd.f32 1.0, %v1410_v20 }
 0x140   :  { %v982_v28 = vmul.f32 %v1412_v24, %v769_v5  ;;  %v974_v29 = vsel %vm973_vm6, %v1406_v3, %v970_v21  ;;  %v1414_v32 = vpop.eup %1413  ;;  %vm987_vm8 = vweird.f32 %v1412_v24 }
 0x141   :  { %v979_v57 = vsel %vm976_vm7, %v978_v25, %v974_v29  ;;  %1415 = vrcp.f32 %v770_v26  ;;  %v1025_v37 = vsub.f32 %v1414_v32, %v1420_v43  ;;  %vm988_vm10 = vmor %vm986_vm9, %vm987_vm8  ;;  %v1007_v47 = vand.u32 2147483648, %v770_v26 }
 0x142   :  { %v983_v15 = vsub.f32 1.0, %v982_v28  ;;  %v1040_v31 = vmul.f32 %v1024_v16, %v979_v57  ;;  %1417 = vtanh.f32 %v459_v12  ;;  %v1005_v52 = vand.u32 2147483647, %v770_v26 }
 0x143   :  { %vm1001_vm13 = vweird.f32 %v770_v26  ;;  %v1008_v54 = vor.u32 1.1754944e-38, %v1007_v47 }
 0x144   :  { %v984_v33 = vmul.f32 %v1412_v24, %v983_v15  ;;  %v1056_v35 = vadd.f32 %v1419_v49, %v1040_v31  ;;  %vm1006_vm15 = vcmp.eq.f32.partialorder %v1005_v52, 8.507059e+37 }
 0x146   :  { %1072 = vst [vmem:[#allocation10 + $0x68] sm:$0xff] %v1056_v35  ;;  %v985_v46 = vadd.f32 %v1412_v24, %v984_v33 }
 0x147   :  { %v1416_v41 = vpop.eup %1415 }
 0x148   :  { %v997_v44 = vmul.f32 %v1416_v41, %v770_v26  ;;  %v989_v45 = vsel %vm988_vm10, %v1412_v24, %v985_v46  ;;  %vm1002_vm12 = vweird.f32 %v1416_v41  ;;  %v1418_v53 = vpop.eup %1417 }
 0x149   :  { %v994_v8 = vsel %vm991_vm11, %v993_v17, %v989_v45  ;;  %vm1003_vm14 = vmor %vm1001_vm13, %vm1002_vm12  ;;  %v1026_v55 = vsub.f32 %v1418_v53, %v1421_v39 }
 0x14a   :  { %v998_v42 = vsub.f32 1.0, %v997_v44  ;;  %v1041_v36 = vmul.f32 %v1025_v37, %v994_v8 }
 0x14c   :  { %v999_v50 = vmul.f32 %v1416_v41, %v998_v42  ;;  %v1057_v51 = vadd.f32 %v1420_v43, %v1041_v36 }
 0x14e   :  { %1073 = vst [vmem:[#allocation10 + $0x70] sm:$0xff] %v1057_v51  ;;  %v1000_v23 = vadd.f32 %v1416_v41, %v999_v50 }
 0x150   :  { %v1004_v0 = vsel %vm1003_vm14, %v1416_v41, %v1000_v23 }
 0x151   :  { %v1009_v58 = vsel %vm1006_vm15, %v1008_v54, %v1004_v0 }
 0x152   :  { %v1042_v59 = vmul.f32 %v1026_v55, %v1009_v58 }
 0x154   :  { %v1058_v60 = vadd.f32 %v1421_v39, %v1042_v59 }
 0x156   :  { %1074 = vst [vmem:[#allocation10 + $0x78] sm:$0xff] %v1058_v60 }
 0x157   :  { %1078 = vsyncadd [#allocation4], 1664  ;;  %s1081_s21 = sshll.u32 %s1852_s6, 4  ;;  %s1558_s22 = smov [#allocation10]   ;;  %s1082_s21 = int_to_ptr.hbm [resolvable:$true] %s1081_s21 }
 0x158   :  { %s1079_s23 = sshll.u32 %s1558_s22, 4  ;;  %s1080_s23 = int_to_ptr.vmem [resolvable:$true] %s1079_s23 }
 0x159   :  { %1087 = dma.vmem_to_hbm [thread:$0]  %s1080_s23, 384, %s1082_s21, [#allocation4], %s1551_s26, %s1551_s26, %s1552_s27  }
 0x15a   :  { %1548 = dma.done.wait [#allocation4], 2048  }
 0x15b   :  { %1549 = vsyncadd [#allocation4], 4294965248 }
 0x15c   :  { %1092 = vsyncpa [#allocation3], 1 }
 0x15d   :  { %1093 = vsyncpa [#allocation6], 1 }
 0x15e   :  { %1094 = vsyncpa [#allocation9], 1 }
 0x15f   :  { %1095 = vsyncpa [#allocation4], 1 }

</bundles_post_ra>
